<compile_context>
chip_gen: v7x
topology: tpu7x:2x2x1
jax: 0.10.0
libtpu: 0.0.40
codegen_flags: <defaults>
</compile_context>

<pallas_src>
import functools

import jax
import jax.numpy as jnp
import numpy as np
from jax.experimental import pallas as pl
from jax.experimental.pallas import tpu as pltpu


def _round_up(x, m):
    return (x + m - 1) // m * m


def _cdiv(a, b):
    return (a + b - 1) // b


def _vmem_budget():
    """(per-input-block byte budget, scoped-VMEM limit) per TPU generation."""
    phys = None
    try:
        phys = getattr(pltpu.get_tpu_info(), "vmem_capacity_bytes", None)
    except Exception:
        phys = None
    if phys is not None and phys >= 128 * 1024 * 1024:     # v5e / v6e: 128 MiB
        return 16 * 1024 * 1024, 64 * 1024 * 1024
    # v7x (64 MiB physical VMEM) or unknown generation: stay conservative.
    return 8 * 1024 * 1024, 32 * 1024 * 1024


def _gap_full_kernel(x_ref, o_ref, *, inv_count):
    # Full spatial extent in one block: single cross-lane (XLU) reduce + scale.
    x = x_ref[...].astype(jnp.float32)
    o_ref[...] = jnp.sum(x, axis=-1, keepdims=True) * inv_count


def _gap_tiled_kernel(x_ref, o_ref, *, inv_count, valid_s, tile_s, mask_last):
    # Spatial (reduction) axis is the last, "arbitrary" grid axis.  The output
    # block index ignores it, so o_ref stays resident in VMEM across the whole
    # reduction and doubles as the f32 accumulator (no scratch buffer).
    s = pl.program_id(1)

    @pl.when(s == 0)
    def _():
        o_ref[...] = jnp.zeros_like(o_ref)

    x = x_ref[...].astype(jnp.float32)
    if mask_last:
        # Ragged last spatial tile: lanes past the true extent read unspecified
        # memory -> zero them (sum-neutral) before accumulating.
        lane = jax.lax.broadcasted_iota(jnp.int32, x.shape, 1) + s * tile_s
        x = jnp.where(lane < valid_s, x, 0.0)
    o_ref[...] += jnp.sum(x, axis=-1, keepdims=True)

    @pl.when(s == pl.num_programs(1) - 1)
    def _():
        o_ref[...] *= inv_count


@functools.partial(jax.jit, static_argnames=("block_budget_bytes",))
def global_average_pooling(feat, block_budget_bytes=None):
    """feat: (N, C, H, W) -> (N, C), mean over the full spatial extent."""
    N, C, H, W = feat.shape
    R, S = N * C, H * W
    x = feat.reshape(R, S)                    # contiguous NCHW: free reshape

    itemsize = jnp.dtype(feat.dtype).itemsize
    sub = 16 if itemsize == 2 else 8          # sublane granularity (bf16: 16)
    auto_budget, vmem_limit = _vmem_budget()
    budget = auto_budget if block_budget_bytes is None else block_budget_bytes

    inv_count = 1.0 / float(S)
    cost = pl.CostEstimate(flops=R * S, transcendentals=0,
                           bytes_accessed=R * S * itemsize + R * 4)

    if S * sub * itemsize <= budget:
        # ---- common GAP case: full-width spatial block, 1-D grid over rows.
        # Budget per step = input block + lane-padded (tile_r, 1) f32 output.
        row_bytes = S * itemsize + 128 * 4
        max_r = max(sub, (budget // row_bytes) // sub * sub)
        # >= 2 row tiles whenever possible so v7x megacore shards row blocks.
        desired_r = _round_up(_cdiv(R, 2), sub)
        tile_r = max(sub, min(desired_r, max_r))
        out = pl.pallas_call(
            functools.partial(_gap_full_kernel, inv_count=inv_count),
            out_shape=jax.ShapeDtypeStruct((R, 1), jnp.float32),
            grid_spec=pltpu.PrefetchScalarGridSpec(
                num_scalar_prefetch=0,
                grid=(_cdiv(R, tile_r),),
                in_specs=[pl.BlockSpec((tile_r, S), lambda r: (r, 0))],
                out_specs=pl.BlockSpec((tile_r, 1), lambda r: (r, 0)),
            ),
            compiler_params=pltpu.CompilerParams(
                dimension_semantics=("parallel",),
                vmem_limit_bytes=vmem_limit),
            cost_estimate=cost,
        )(x)
    else:
        # ---- huge spatial extent: tile the reduction axis (last, arbitrary),
        # mask the ragged final spatial tile in-kernel, accumulate into o_ref.
        tile_r = sub
        tile_s = max(128, (budget // (tile_r * itemsize)) // 128 * 128)
        out = pl.pallas_call(
            functools.partial(_gap_tiled_kernel, inv_count=inv_count,
                              valid_s=S, tile_s=tile_s,
                              mask_last=(S % tile_s) != 0),
            out_shape=jax.ShapeDtypeStruct((R, 1), jnp.float32),
            grid_spec=pltpu.PrefetchScalarGridSpec(
                num_scalar_prefetch=0,
                grid=(_cdiv(R, tile_r), _cdiv(S, tile_s)),
                in_specs=[pl.BlockSpec((tile_r, tile_s), lambda r, s: (r, s))],
                out_specs=pl.BlockSpec((tile_r, 1), lambda r, s: (r, 0)),
            ),
            compiler_params=pltpu.CompilerParams(
                dimension_semantics=("parallel", "arbitrary"),
                vmem_limit_bytes=vmem_limit),
            cost_estimate=cost,
        )(x)

    return out[:, 0].reshape(N, C).astype(feat.dtype)


if __name__ == "__main__":
    key = jax.random.PRNGKey(0)
    k1, k2, k3, k4 = jax.random.split(key, 4)

    # 1: shapes implied by module usage (batch=2, channels=4, 16x16 feature map)
    feat = jax.random.normal(k1, (2, 4, 16, 16), jnp.float32)
    out = jax.block_until_ready(global_average_pooling(feat))
    ref = jnp.mean(feat, axis=(2, 3))
    assert out.shape == (2, 4), out.shape
    np.testing.assert_allclose(np.asarray(out), np.asarray(ref),
                               rtol=1e-5, atol=1e-5)

    # 2: ragged rows (N*C = 15) + odd spatial extent (63) -> ragged row block,
    #    full-width spatial block exempt from the 128-lane rule.
    feat2 = jax.random.normal(k2, (3, 5, 7, 9), jnp.float32)
    out2 = jax.block_until_ready(global_average_pooling(feat2))
    ref2 = jnp.mean(feat2, axis=(2, 3))
    assert out2.shape == (3, 5), out2.shape
    np.testing.assert_allclose(np.asarray(out2), np.asarray(ref2),
                               rtol=1e-5, atol=1e-5)

    # 3: larger spatial extent, still the single-block fast path.
    feat3 = jax.random.normal(k3, (2, 8, 64, 80), jnp.float32)
    out3 = jax.block_until_ready(global_average_pooling(feat3))
    ref3 = jnp.mean(feat3, axis=(2, 3))
    assert out3.shape == (2, 8), out3.shape
    np.testing.assert_allclose(np.asarray(out3), np.asarray(ref3),
                               rtol=1e-5, atol=1e-5)

    # 4: force the tiled-reduction path (tiny block budget) so the masked
    #    ragged spatial tile + resident-output accumulation is exercised at
    #    small shapes (S=5120 with tile_s=2048 -> ragged last spatial tile).
    feat4 = jax.random.normal(k4, (3, 5, 64, 80), jnp.float32)
    out4 = jax.block_until_ready(
        global_average_pooling(feat4, block_budget_bytes=64 * 1024))
    ref4 = jnp.mean(feat4, axis=(2, 3))
    assert out4.shape == (3, 5), out4.shape
    np.testing.assert_allclose(np.asarray(out4), np.asarray(ref4),
                               rtol=1e-5, atol=1e-5)

    print("KERNEL_OK")
</pallas_src>

<mosaic_0001>
module attributes {stable_mosaic.version = 11 : i64} {
  func.func @_gap_full_kernel(%arg0: i32, %arg1: memref<8x256xf32, #tpu.memory_space<vmem>>, %arg2: memref<8x1xf32, #tpu.memory_space<vmem>>) attributes {dimension_semantics = [#tpu.dimension_semantics<parallel>], iteration_bounds = array<i64: 1>, scalar_prefetch = 0 : i64, scratch_operands = 0 : i64, tpu.core_type = #tpu.core_type<tc>, window_params = [{transform_indices = @transform_0, window_bounds = array<i64: 8, 256>}, {transform_indices = @transform_1, window_bounds = array<i64: 8, 1>}]} {
    %c0 = arith.constant 0 : index
    %c0_0 = arith.constant 0 : index
    %0 = vector.load %arg1[%c0, %c0_0] : memref<8x256xf32, #tpu.memory_space<vmem>>, vector<8x256xf32>
    %cst = arith.constant dense<0.000000e+00> : vector<8xf32>
    %1 = vector.multi_reduction <add>, %0, %cst [1] : vector<8x256xf32> to vector<8xf32>
    %2 = vector.shape_cast %1 : vector<8xf32> to vector<8x1xf32>
    %cst_1 = arith.constant 3.906250e-03 : f32
    %3 = vector.broadcast %cst_1 : f32 to vector<8x1xf32>
    %4 = arith.mulf %2, %3 : vector<8x1xf32>
    %c0_2 = arith.constant 0 : index
    %c0_3 = arith.constant 0 : index
    %5 = vector.load %arg2[%c0_2, %c0_3] : memref<8x1xf32, #tpu.memory_space<vmem>>, vector<8x1xf32>
    tpu.vector_store %arg2[%c0_2, %c0_3], %4 {strides = array<i32>} : memref<8x1xf32, #tpu.memory_space<vmem>>, vector<8x1xf32>,
    return
  }
  func.func @transform_0(%arg0: i32) -> (i32, i32) {
    %c0_i32 = arith.constant 0 : i32
    %c0_i32_0 = arith.constant 0 : i32
    return %arg0, %c0_i32 : i32, i32
  }
  func.func @transform_1(%arg0: i32) -> (i32, i32) {
    %c0_i32 = arith.constant 0 : i32
    %c0_i32_0 = arith.constant 0 : i32
    return %arg0, %c0_i32 : i32, i32
  }
}

</mosaic_0001>

<bundles_post_ra>
// kernel: squeeze.1
= control target key start
LH: loop header
LB: loop body
LE: loop exit
PB: predicated region body
PF: predicated region fallthrough
CT: control target
= control target key end

     0   :  { %s85_s0 = inlined_call_operand.vmem [shape: f32[8], index: 0, kind: input, shape index: {}]   ;;  %s86_s1 = inlined_call_operand.hbm [shape: f32[2,4], index: 1, kind: output, shape index: {}]  }
   0x1   :  { %v5_v0 = vld [vmem:[%s85_s0] sm:$0x1] }
   0x2   :  { %2 = vsyncpa [#allocation1], 0  ;;  %6 = vst [vmem:[#allocation3] sm:$0x1] %v5_v0  ;;  %vm8_vm0 = vcmask 31744   ;;  %s58_s0 = smov 124  }
   0x3   :  { %s59_s8 = smov [#allocation0]  }
   0x4   :  { %s26_s9 = sshll.u32 %s59_s8, 4  ;;  %s27_s9 = int_to_ptr.vmem [resolvable:$true] %s26_s9 }
   0x5   :  { %s34_s10 = scalar_lea.vmem %s27_s9, 32  ;;  %p39_p1 = scmp.lt.s32.totalorder %s27_s9, %s27_s9 }
   0x6   :  { %p35_p0 = scmp.ne.s32.totalorder %s27_s9, %s34_s10  ;;  %p40_p2 = scmp.lt.s32.totalorder %s34_s10, %s34_s10 }
   0x8   :  { %p41_p3 = por %p40_p2, %p39_p1 }
   0x9   :  { %v10_v1 = vld [vmem:[#allocation3] sm:$0x1]  }
   0xa   :  { %v7_v2 = vld [vmem:[#allocation3] sm:$0x1]   ;;  %11 = vrot.lane.b32.xlu0 %v10_v1, %s58_s0  ;;  %p42_p4 = pnand %p41_p3, %p35_p0 }
   0xb   :  { %9 = vst.msk [vmem:[#allocation2] sm:$0x1] %vm8_vm0, %v7_v2  }
  0x7c   :  { %v12_v3 = vpop.permute.xlu0 %11  }
  0x7d   :  { %15 = vst.msk [vmem:[#allocation2 + $0x1] sm:$0x1] %vm8_vm0, %v12_v3  }
  0x84   :  { %v19_v4 = vld [vmem:[#allocation2] sm:$0x3] }
  0x85   :  { %21 = vst [vmem:[#allocation0] sm:$0x3] %v19_v4 }
  0x86   :  { %45 = shalt.err (!%p42_p4)
}
  0x87   :  { %s46_s13 = scalar_lea.hbm %s86_s1, 32 }
  0x88   :  { %p47_p5 = scmp.ne.s32.totalorder %s86_s1, %s46_s13  ;;  %p50_p6 = scmp.lt.u32.totalorder %s46_s13, %s86_s1 }
  0x8a   :  { %p52_p7 = pnand %p50_p6, %p47_p5 }
  0x8c   :  { %55 = shalt.err (!%p52_p7)
}
  0x8d   :  { %29 = dma.vmem_to_hbm [thread:$0]  %s27_s9, 32, %s86_s1, [#allocation1]  }
  0x8e   :  { %56 = dma.done.wait [#allocation1], 32  }
  0x8f   :  { %57 = vsyncadd [#allocation1], 4294967264 }
  0x90   :  { %31 = vsyncpa [#allocation1], 1 }

// kernel: global_average_pooling.1
= control target key start
LH: loop header
LB: loop body
LE: loop exit
PB: predicated region body
PF: predicated region fallthrough
CT: control target
= control target key end

     0   :  { %vm14_vm0 = vcmask 7168   ;;  %s39_s0 = inlined_call_operand.vmem [shape: f32[8,256], index: 0, kind: input, shape index: {}]   ;;  %s40_s1 = inlined_call_operand.vmem [shape: f32[8,1], index: 1, kind: output, shape index: {}]  }
   0x1   :  { %v8_v0 = vld [vmem:[%s39_s0] sm:$0xff]  ;;  %v9_v1 = vld [vmem:[%s39_s0 + $0x8] sm:$0xff] }
   0x2   :  { %v10_v2 = vadd.f32 %v9_v1, %v8_v0 }
   0x4   :  { %11 = vadd.xlane.f32.xlu0 %v10_v2 }
  0x91   :  { %v12_v3 = vpop.xlane.xlu0 %11 }
  0x92   :  { %v13_v4 = vmul.f32 0.00390625, %v12_v3 }
  0x94   :  { %15 = vst.msk [vmem:[%s40_s1] sm:$0xff] %vm14_vm0, %v13_v4 }

</bundles_post_ra>
